<compile_context>
chip_gen: v6e
topology: v6e:2x2x1
jax: 0.10.0
libtpu: 0.0.40
codegen_flags: <defaults>
</compile_context>

<pallas_src>
import math

import jax
import jax.numpy as jnp
from jax.experimental import pallas as pl
from jax.experimental.pallas import tpu as pltpu

LN_EPS = 1e-5


def _round_up(n, m):
    return ((n + m - 1) // m) * m


# --------------------------------------------------------------------------------------
# Fused ResMLP kernel
# --------------------------------------------------------------------------------------
def _resmlp_kernel(x_ref, w1_ref, b1_ref, w2_ref, b2_ref, g_ref, beta_ref, o_ref):
    x = x_ref[...].astype(jnp.float32)            # (tm, emb)
    b1 = b1_ref[...].astype(jnp.float32)          # (1, bneck)
    b2 = b2_ref[...].astype(jnp.float32)          # (1, emb)
    gamma = g_ref[...].astype(jnp.float32)        # (1, emb)
    beta = beta_ref[...].astype(jnp.float32)      # (1, emb)

    # Linear 1 + ReLU  (MXU, f32 accumulate; bias + ReLU folded into the same expression)
    h = jnp.maximum(jnp.dot(x, w1_ref[...], preferred_element_type=jnp.float32) + b1, 0.0)
    # Linear 2
    y = jnp.dot(h, w2_ref[...], preferred_element_type=jnp.float32) + b2

    # LayerNorm over the emb axis (biased variance), in f32
    mean = jnp.mean(y, axis=-1, keepdims=True)
    cent = y - mean
    var = jnp.mean(cent * cent, axis=-1, keepdims=True)
    y = cent * jax.lax.rsqrt(var + LN_EPS) * gamma + beta

    # Dropout is identity in eval mode.
    o_ref[...] = (y + x).astype(o_ref.dtype)      # residual


def resmlp_forward(x, params, *, tm_max=512):
    """x: (..., emb). params: dict w1 (emb,bneck), b1, w2 (bneck,emb), b2, gamma, beta."""
    orig_shape = x.shape
    emb = orig_shape[-1]
    rows = math.prod(orig_shape[:-1])
    bneck = params["w1"].shape[1]

    x2d = x.reshape(rows, emb)
    tm = min(tm_max, _round_up(rows, 8))
    rows_p = _round_up(rows, tm)
    if rows_p != rows:
        x2d = jnp.pad(x2d, ((0, rows_p - rows), (0, 0)))
    grid = (rows_p // tm,)

    b1 = params["b1"].reshape(1, bneck)
    b2 = params["b2"].reshape(1, emb)
    gamma = params["gamma"].reshape(1, emb)
    beta = params["beta"].reshape(1, emb)

    flops = 4 * rows_p * emb * bneck + 10 * rows_p * emb
    bytes_accessed = (2 * rows_p * emb + 2 * emb * bneck + bneck + 3 * emb) * 4
    cost = pl.CostEstimate(flops=flops, transcendentals=rows_p, bytes_accessed=bytes_accessed)

    # x/out tiles double-buffered + resident weights (default double-buffered) + params.
    vmem_est = (2 * 2 * tm * emb + 2 * 2 * emb * bneck + 2 * (bneck + 3 * emb)) * 4
    vmem_limit = min(64 * 1024 * 1024, max(32 * 1024 * 1024, 2 * vmem_est))

    out2d = pl.pallas_call(
        _resmlp_kernel,
        out_shape=jax.ShapeDtypeStruct((rows_p, emb), x.dtype),
        grid_spec=pltpu.PrefetchScalarGridSpec(
            num_scalar_prefetch=0,
            grid=grid,
            in_specs=[
                pl.BlockSpec((tm, emb), lambda i: (i, 0)),       # x rows (tiled)
                # Constant-index blocks: stay resident in VMEM, no re-DMA per grid step.
                pl.BlockSpec((emb, bneck), lambda i: (0, 0)),    # w1
                pl.BlockSpec((1, bneck), lambda i: (0, 0)),      # b1
                pl.BlockSpec((bneck, emb), lambda i: (0, 0)),    # w2
                pl.BlockSpec((1, emb), lambda i: (0, 0)),        # b2
                pl.BlockSpec((1, emb), lambda i: (0, 0)),        # gamma
                pl.BlockSpec((1, emb), lambda i: (0, 0)),        # beta
            ],
            out_specs=pl.BlockSpec((tm, emb), lambda i: (i, 0)),
        ),
        compiler_params=pltpu.CompilerParams(
            dimension_semantics=("parallel",),
            vmem_limit_bytes=vmem_limit,
        ),
        cost_estimate=cost,
    )(x2d, params["w1"], b1, params["w2"], b2, gamma, beta)

    if rows_p != rows:
        out2d = out2d[:rows]
    return out2d.reshape(orig_shape)


# --------------------------------------------------------------------------------------
# Plain Linear kernel (x @ W + b) for the sketch/image prompt projections
# --------------------------------------------------------------------------------------
def _linear_kernel(x_ref, w_ref, b_ref, o_ref):
    x = x_ref[...].astype(jnp.float32)
    y = jnp.dot(x, w_ref[...], preferred_element_type=jnp.float32)
    y = y + b_ref[...].astype(jnp.float32)
    o_ref[...] = y.astype(o_ref.dtype)


def linear_forward(x, w, b, *, tm_max=512):
    """x: (..., din); w: (din, dout); b: (dout,)."""
    orig_shape = x.shape
    din = orig_shape[-1]
    dout = w.shape[1]
    rows = math.prod(orig_shape[:-1])

    x2d = x.reshape(rows, din)
    tm = min(tm_max, _round_up(rows, 8))
    rows_p = _round_up(rows, tm)
    if rows_p != rows:
        x2d = jnp.pad(x2d, ((0, rows_p - rows), (0, 0)))
    b2d = b.reshape(1, dout)

    flops = 2 * rows_p * din * dout
    bytes_accessed = (rows_p * (din + dout) + din * dout + dout) * 4
    cost = pl.CostEstimate(flops=flops, transcendentals=0, bytes_accessed=bytes_accessed)

    vmem_est = (2 * tm * (din + dout) + 2 * din * dout + 2 * dout) * 4
    vmem_limit = min(64 * 1024 * 1024, max(32 * 1024 * 1024, 2 * vmem_est))

    out2d = pl.pallas_call(
        _linear_kernel,
        out_shape=jax.ShapeDtypeStruct((rows_p, dout), x.dtype),
        grid_spec=pltpu.PrefetchScalarGridSpec(
            num_scalar_prefetch=0,
            grid=(rows_p // tm,),
            in_specs=[
                pl.BlockSpec((tm, din), lambda i: (i, 0)),
                pl.BlockSpec((din, dout), lambda i: (0, 0)),
                pl.BlockSpec((1, dout), lambda i: (0, 0)),
            ],
            out_specs=pl.BlockSpec((tm, dout), lambda i: (i, 0)),
        ),
        compiler_params=pltpu.CompilerParams(
            dimension_semantics=("parallel",),
            vmem_limit_bytes=vmem_limit,
        ),
        cost_estimate=cost,
    )(x2d, w, b2d)

    if rows_p != rows:
        out2d = out2d[:rows]
    return out2d.reshape(orig_shape[:-1] + (dout,))


# --------------------------------------------------------------------------------------
# MultiModalPromptLearner forward (eval mode)
# --------------------------------------------------------------------------------------
def multimodal_prompt_learner_forward(params):
    ctx = params["ctx"]                               # (n_ctx, ctx_dim)
    compound = params["compound_prompts_text"]        # list of (n_ctx, ctx_dim)

    if params["res_mlp"]:
        ctx = resmlp_forward(ctx, params["first_res_mlp"])
        # Mirrors the in-place `compound_prompts_text[i].data = res_mlp_i(...)` update:
        compound = [resmlp_forward(p, mlp)
                    for p, mlp in zip(compound, params["compound_res_mlp"])]

    sketch_first = linear_forward(ctx, params["sketch_first_proj"]["w"],
                                  params["sketch_first_proj"]["b"])
    image_first = linear_forward(ctx, params["image_first_proj"]["w"],
                                 params["image_first_proj"]["b"])

    n_cls = params["token_prefix"].shape[0]
    ctx_exp = jnp.broadcast_to(ctx[None], (n_cls,) + ctx.shape)
    # construct_prompts: pure layout -> plain concatenate along the token axis.
    text_first = jnp.concatenate(
        [params["token_prefix"], ctx_exp, params["token_suffix"]], axis=1)

    sketch_deep = [linear_forward(p, lp["w"], lp["b"])
                   for p, lp in zip(compound, params["sketch_compound_proj"])]
    image_deep = [linear_forward(p, lp["w"], lp["b"])
                  for p, lp in zip(compound, params["image_compound_proj"])]

    return (text_first, sketch_first, image_first, compound, sketch_deep, image_deep)


# --------------------------------------------------------------------------------------
# Parameter init (matches PyTorch defaults) and pure-JAX reference
# --------------------------------------------------------------------------------------
def init_resmlp_params(key, emb, bneck):
    k1, k2, k3, k4 = jax.random.split(key, 4)
    lim1 = 1.0 / math.sqrt(emb)
    lim2 = 1.0 / math.sqrt(bneck)
    return {
        # stored as (in, out) so the kernel does x @ w (== PyTorch x @ W.T)
        "w1": jax.random.uniform(k1, (emb, bneck), jnp.float32, -lim1, lim1),
        "b1": jax.random.uniform(k2, (bneck,), jnp.float32, -lim1, lim1),
        "w2": jax.random.uniform(k3, (bneck, emb), jnp.float32, -lim2, lim2),
        "b2": jax.random.uniform(k4, (emb,), jnp.float32, -lim2, lim2),
        "gamma": jnp.ones((emb,), jnp.float32),
        "beta": jnp.zeros((emb,), jnp.float32),
    }


def init_linear_params(key, din, dout):
    k1, k2 = jax.random.split(key)
    lim = 1.0 / math.sqrt(din)
    return {"w": jax.random.uniform(k1, (din, dout), jnp.float32, -lim, lim),
            "b": jax.random.uniform(k2, (dout,), jnp.float32, -lim, lim)}


def init_module_params(key, *, n_cls, n_ctx, ctx_dim, vis_dim, depth, bneck, suffix_len):
    keys = jax.random.split(key, 10)
    n_compound = depth - 1
    # get_clones deep-copies one layer -> identical initial weights for each clone.
    sketch_layer = init_linear_params(keys[4], ctx_dim, vis_dim)
    image_layer = init_linear_params(keys[5], ctx_dim, vis_dim)
    compound_mlp = init_resmlp_params(keys[6], ctx_dim, bneck)
    # TODO(synk): token_prefix / token_suffix come from CLIP tokenization + token_embedding
    # in the original constructor; replaced by deterministic random buffers here.
    return {
        "res_mlp": True,
        "ctx": 0.02 * jax.random.normal(keys[0], (n_ctx, ctx_dim), jnp.float32),
        "compound_prompts_text": [
            0.02 * jax.random.normal(k, (n_ctx, ctx_dim), jnp.float32)
            for k in jax.random.split(keys[1], n_compound)
        ],
        "first_res_mlp": init_resmlp_params(keys[2], ctx_dim, bneck),
        "compound_res_mlp": [compound_mlp for _ in range(n_compound)],
        "sketch_first_proj": init_linear_params(keys[3], ctx_dim, vis_dim),
        "image_first_proj": init_linear_params(keys[7], ctx_dim, vis_dim),
        "sketch_compound_proj": [sketch_layer for _ in range(n_compound)],
        "image_compound_proj": [image_layer for _ in range(n_compound)],
        "token_prefix": jax.random.normal(keys[8], (n_cls, 1, ctx_dim), jnp.float32),
        "token_suffix": jax.random.normal(keys[9], (n_cls, suffix_len, ctx_dim), jnp.float32),
    }


_HP = jax.lax.Precision.HIGHEST


def _resmlp_ref(x, p):
    h = jnp.maximum(jnp.dot(x, p["w1"], precision=_HP) + p["b1"], 0.0)
    y = jnp.dot(h, p["w2"], precision=_HP) + p["b2"]
    mean = jnp.mean(y, axis=-1, keepdims=True)
    var = jnp.mean((y - mean) ** 2, axis=-1, keepdims=True)
    y = (y - mean) * jax.lax.rsqrt(var + LN_EPS) * p["gamma"] + p["beta"]
    return y + x


def _linear_ref(x, lp):
    return jnp.dot(x, lp["w"], precision=_HP) + lp["b"]


def _forward_ref(params):
    ctx = params["ctx"]
    compound = params["compound_prompts_text"]
    if params["res_mlp"]:
        ctx = _resmlp_ref(ctx, params["first_res_mlp"])
        compound = [_resmlp_ref(p, mlp)
                    for p, mlp in zip(compound, params["compound_res_mlp"])]
    sketch_first = _linear_ref(ctx, params["sketch_first_proj"])
    image_first = _linear_ref(ctx, params["image_first_proj"])
    n_cls = params["token_prefix"].shape[0]
    ctx_exp = jnp.broadcast_to(ctx[None], (n_cls,) + ctx.shape)
    text_first = jnp.concatenate(
        [params["token_prefix"], ctx_exp, params["token_suffix"]], axis=1)
    sketch_deep = [_linear_ref(p, lp) for p, lp in zip(compound, params["sketch_compound_proj"])]
    image_deep = [_linear_ref(p, lp) for p, lp in zip(compound, params["image_compound_proj"])]
    return (text_first, sketch_first, image_first, compound, sketch_deep, image_deep)


if __name__ == "__main__":
    key = jax.random.PRNGKey(0)
    # Small counts but CLIP-like feature dims so the lane (last) axes are multiples of 128.
    n_cls, n_ctx, ctx_dim, vis_dim, depth, bneck, suffix_len = 2, 4, 512, 768, 3, 128, 11
    params = init_module_params(key, n_cls=n_cls, n_ctx=n_ctx, ctx_dim=ctx_dim,
                                vis_dim=vis_dim, depth=depth, bneck=bneck,
                                suffix_len=suffix_len)

    outputs = multimodal_prompt_learner_forward(params)
    outputs = jax.block_until_ready(outputs)
    refs = _forward_ref(params)

    def _check(a, b, name):
        assert a.shape == b.shape, (name, a.shape, b.shape)
        assert jnp.allclose(a, b, atol=2e-2, rtol=2e-2), (
            name, float(jnp.max(jnp.abs(a - b))))

    for name, o, r in zip(["text_first", "sketch_first", "image_first"],
                          outputs[:3], refs[:3]):
        _check(o, r, name)
    for i, (o, r) in enumerate(zip(outputs[3], refs[3])):
        _check(o, r, f"compound_{i}")
    for i, (o, r) in enumerate(zip(outputs[4], refs[4])):
        _check(o, r, f"sketch_deep_{i}")
    for i, (o, r) in enumerate(zip(outputs[5], refs[5])):
        _check(o, r, f"image_deep_{i}")

    # Also exercise the row-tiled / padded path (multiple grid steps, rows % tm != 0).
    xb = jax.random.normal(jax.random.PRNGKey(1), (3, 345, ctx_dim), jnp.float32)
    big = jax.block_until_ready(resmlp_forward(xb, params["first_res_mlp"], tm_max=256))
    big_ref = _resmlp_ref(xb, params["first_res_mlp"])
    assert jnp.allclose(big, big_ref, atol=2e-2, rtol=2e-2), float(
        jnp.max(jnp.abs(big - big_ref)))

    print("KERNEL_OK")
</pallas_src>

<mosaic_0001>
module attributes {stable_mosaic.version = 11 : i64} {
  func.func @_resmlp_kernel(%arg0: i32, %arg1: memref<8x512xf32, #tpu.memory_space<vmem>>, %arg2: memref<512x128xf32, #tpu.memory_space<vmem>>, %arg3: memref<1x128xf32, #tpu.memory_space<vmem>>, %arg4: memref<128x512xf32, #tpu.memory_space<vmem>>, %arg5: memref<1x512xf32, #tpu.memory_space<vmem>>, %arg6: memref<1x512xf32, #tpu.memory_space<vmem>>, %arg7: memref<1x512xf32, #tpu.memory_space<vmem>>, %arg8: memref<8x512xf32, #tpu.memory_space<vmem>>) attributes {dimension_semantics = [#tpu.dimension_semantics<parallel>], iteration_bounds = array<i64: 1>, scalar_prefetch = 0 : i64, scratch_operands = 0 : i64, tpu.core_type = #tpu.core_type<tc>, window_params = [{transform_indices = @transform_0, window_bounds = array<i64: 8, 512>}, {pipeline_mode = #tpu.pipeline_mode<synchronous>, transform_indices = @transform_1, window_bounds = array<i64: 512, 128>}, {pipeline_mode = #tpu.pipeline_mode<synchronous>, transform_indices = @transform_2, window_bounds = array<i64: 1, 128>}, {pipeline_mode = #tpu.pipeline_mode<synchronous>, transform_indices = @transform_3, window_bounds = array<i64: 128, 512>}, {pipeline_mode = #tpu.pipeline_mode<synchronous>, transform_indices = @transform_4, window_bounds = array<i64: 1, 512>}, {pipeline_mode = #tpu.pipeline_mode<synchronous>, transform_indices = @transform_5, window_bounds = array<i64: 1, 512>}, {pipeline_mode = #tpu.pipeline_mode<synchronous>, transform_indices = @transform_6, window_bounds = array<i64: 1, 512>}, {transform_indices = @transform_7, window_bounds = array<i64: 8, 512>}]} {
    %c0 = arith.constant 0 : index
    %c0_0 = arith.constant 0 : index
    %0 = vector.load %arg1[%c0, %c0_0] : memref<8x512xf32, #tpu.memory_space<vmem>>, vector<8x512xf32>
    %c0_1 = arith.constant 0 : index
    %c0_2 = arith.constant 0 : index
    %1 = vector.load %arg3[%c0_1, %c0_2] : memref<1x128xf32, #tpu.memory_space<vmem>>, vector<1x128xf32>
    %c0_3 = arith.constant 0 : index
    %c0_4 = arith.constant 0 : index
    %2 = vector.load %arg5[%c0_3, %c0_4] : memref<1x512xf32, #tpu.memory_space<vmem>>, vector<1x512xf32>
    %c0_5 = arith.constant 0 : index
    %c0_6 = arith.constant 0 : index
    %3 = vector.load %arg6[%c0_5, %c0_6] : memref<1x512xf32, #tpu.memory_space<vmem>>, vector<1x512xf32>
    %c0_7 = arith.constant 0 : index
    %c0_8 = arith.constant 0 : index
    %4 = vector.load %arg7[%c0_7, %c0_8] : memref<1x512xf32, #tpu.memory_space<vmem>>, vector<1x512xf32>
    %c0_9 = arith.constant 0 : index
    %c0_10 = arith.constant 0 : index
    %5 = vector.load %arg2[%c0_9, %c0_10] : memref<512x128xf32, #tpu.memory_space<vmem>>, vector<512x128xf32>
    %cst = arith.constant dense<0.000000e+00> : vector<8x128xf32>
    %6 = tpu.matmul %0, %5, %cst {dimension_numbers = #tpu.dot_dimension_numbers<[1], [0], [0], [1], [0, 0, 1, 1], [], []>} : vector<8x512xf32>, vector<512x128xf32>, vector<8x128xf32> -> vector<8x128xf32>
    %7 = vector.broadcast %1 : vector<1x128xf32> to vector<8x128xf32>
    %8 = arith.addf %6, %7 : vector<8x128xf32>
    %cst_11 = arith.constant 0.000000e+00 : f32
    %9 = vector.broadcast %cst_11 : f32 to vector<8x128xf32>
    %10 = arith.maximumf %8, %9 : vector<8x128xf32>
    %c0_12 = arith.constant 0 : index
    %c0_13 = arith.constant 0 : index
    %11 = vector.load %arg4[%c0_12, %c0_13] : memref<128x512xf32, #tpu.memory_space<vmem>>, vector<128x512xf32>
    %cst_14 = arith.constant dense<0.000000e+00> : vector<8x512xf32>
    %12 = tpu.matmul %10, %11, %cst_14 {dimension_numbers = #tpu.dot_dimension_numbers<[1], [0], [0], [1], [0, 0, 1, 1], [], []>} : vector<8x128xf32>, vector<128x512xf32>, vector<8x512xf32> -> vector<8x512xf32>
    %13 = vector.broadcast %2 : vector<1x512xf32> to vector<8x512xf32>
    %14 = arith.addf %12, %13 : vector<8x512xf32>
    %cst_15 = arith.constant dense<0.000000e+00> : vector<8xf32>
    %15 = vector.multi_reduction <add>, %14, %cst_15 [1] : vector<8x512xf32> to vector<8xf32>
    %16 = vector.shape_cast %15 : vector<8xf32> to vector<8x1xf32>
    %cst_16 = arith.constant 5.120000e+02 : f32
    %17 = vector.broadcast %cst_16 : f32 to vector<8x1xf32>
    %18 = arith.divf %16, %17 : vector<8x1xf32>
    %19 = vector.broadcast %18 : vector<8x1xf32> to vector<8x512xf32>
    %20 = arith.subf %14, %19 : vector<8x512xf32>
    %21 = arith.mulf %20, %20 : vector<8x512xf32>
    %cst_17 = arith.constant dense<0.000000e+00> : vector<8xf32>
    %22 = vector.multi_reduction <add>, %21, %cst_17 [1] : vector<8x512xf32> to vector<8xf32>
    %23 = vector.shape_cast %22 : vector<8xf32> to vector<8x1xf32>
    %cst_18 = arith.constant 5.120000e+02 : f32
    %24 = vector.broadcast %cst_18 : f32 to vector<8x1xf32>
    %25 = arith.divf %23, %24 : vector<8x1xf32>
    %cst_19 = arith.constant 9.99999974E-6 : f32
    %26 = vector.broadcast %cst_19 : f32 to vector<8x1xf32>
    %27 = arith.addf %25, %26 : vector<8x1xf32>
    %28 = math.rsqrt %27 : vector<8x1xf32>
    %29 = vector.broadcast %28 : vector<8x1xf32> to vector<8x512xf32>
    %30 = arith.mulf %20, %29 : vector<8x512xf32>
    %31 = vector.broadcast %3 : vector<1x512xf32> to vector<8x512xf32>
    %32 = arith.mulf %30, %31 : vector<8x512xf32>
    %33 = vector.broadcast %4 : vector<1x512xf32> to vector<8x512xf32>
    %34 = arith.addf %32, %33 : vector<8x512xf32>
    %35 = arith.addf %34, %0 : vector<8x512xf32>
    %c0_20 = arith.constant 0 : index
    %c0_21 = arith.constant 0 : index
    %36 = vector.load %arg8[%c0_20, %c0_21] : memref<8x512xf32, #tpu.memory_space<vmem>>, vector<8x512xf32>
    tpu.vector_store %arg8[%c0_20, %c0_21], %35 {strides = array<i32>} : memref<8x512xf32, #tpu.memory_space<vmem>>, vector<8x512xf32>,
    return
  }
  func.func @transform_0(%arg0: i32) -> (i32, i32) {
    %c0_i32 = arith.constant 0 : i32
    %c0_i32_0 = arith.constant 0 : i32
    return %arg0, %c0_i32 : i32, i32
  }
  func.func @transform_1(%arg0: i32) -> (i32, i32) {
    %c0_i32 = arith.constant 0 : i32
    %c0_i32_0 = arith.constant 0 : i32
    %c0_i32_1 = arith.constant 0 : i32
    return %c0_i32, %c0_i32_0 : i32, i32
  }
  func.func @transform_2(%arg0: i32) -> (i32, i32) {
    %c0_i32 = arith.constant 0 : i32
    %c0_i32_0 = arith.constant 0 : i32
    %c0_i32_1 = arith.constant 0 : i32
    return %c0_i32, %c0_i32_0 : i32, i32
  }
  func.func @transform_3(%arg0: i32) -> (i32, i32) {
    %c0_i32 = arith.constant 0 : i32
    %c0_i32_0 = arith.constant 0 : i32
    %c0_i32_1 = arith.constant 0 : i32
    return %c0_i32, %c0_i32_0 : i32, i32
  }
  func.func @transform_4(%arg0: i32) -> (i32, i32) {
    %c0_i32 = arith.constant 0 : i32
    %c0_i32_0 = arith.constant 0 : i32
    %c0_i32_1 = arith.constant 0 : i32
    return %c0_i32, %c0_i32_0 : i32, i32
  }
  func.func @transform_5(%arg0: i32) -> (i32, i32) {
    %c0_i32 = arith.constant 0 : i32
    %c0_i32_0 = arith.constant 0 : i32
    %c0_i32_1 = arith.constant 0 : i32
    return %c0_i32, %c0_i32_0 : i32, i32
  }
  func.func @transform_6(%arg0: i32) -> (i32, i32) {
    %c0_i32 = arith.constant 0 : i32
    %c0_i32_0 = arith.constant 0 : i32
    %c0_i32_1 = arith.constant 0 : i32
    return %c0_i32, %c0_i32_0 : i32, i32
  }
  func.func @transform_7(%arg0: i32) -> (i32, i32) {
    %c0_i32 = arith.constant 0 : i32
    %c0_i32_0 = arith.constant 0 : i32
    return %arg0, %c0_i32 : i32, i32
  }
}

</mosaic_0001>

<bundles_post_ra>
// kernel: tpu_custom_call.1
= control target key start
LH: loop header
LB: loop body
LE: loop exit
PB: predicated region body
PF: predicated region fallthrough
CT: control target
= control target key end

     0   :  { %12 = vsyncpa [#allocation3], 0  ;;  %s907_s0 = inlined_call_operand.hbm [shape: f32[8,512], index: 0, kind: input, shape index: {}]   ;;  %s908_s1 = inlined_call_operand.hbm [shape: f32[512,128], index: 1, kind: input, shape index: {}]   ;;  %s909_s2 = inlined_call_operand.vmem [shape: f32[1,128], index: 2, kind: input, shape index: {}]   ;;  %s910_s3 = inlined_call_operand.hbm [shape: f32[128,512], index: 3, kind: input, shape index: {}]   ;;  %s911_s4 = inlined_call_operand.vmem [shape: f32[1,512], index: 4, kind: input, shape index: {}]   ;;  %s912_s5 = inlined_call_operand.vmem [shape: f32[1,512], index: 5, kind: input, shape index: {}]   ;;  %s913_s6 = inlined_call_operand.hbm [shape: f32[1,512], index: 6, kind: input, shape index: {}]   ;;  %s914_s7 = inlined_call_operand.hbm [shape: f32[8,512], index: 7, kind: output, shape index: {}]  }
   0x1   :  { %13 = vsyncpa [#allocation6], 0 }
   0x2   :  { %14 = vsyncpa [#allocation9], 0 }
   0x3   :  { %15 = vsyncpa [#allocation4], 0  ;;  %s817_s24 = smov [#allocation5]  }
   0x4   :  { %s31_s25 = sshll.u32 %s817_s24, 4  ;;  %s32_s25 = int_to_ptr.vmem [resolvable:$true] %s31_s25 }
   0x5   :  { %s717_s26 = scalar_lea.vmem %s32_s25, 8192  ;;  %p722_p1 = scmp.lt.s32.totalorder %s32_s25, %s32_s25 }
   0x6   :  { %p718_p0 = scmp.ne.s32.totalorder %s32_s25, %s717_s26  ;;  %p723_p2 = scmp.lt.s32.totalorder %s717_s26, %s717_s26 }
   0x8   :  { %p724_p3 = por %p723_p2, %p722_p1 }
   0xa   :  { %p725_p4 = pnand %p724_p3, %p718_p0 }
   0xc   :  { %728 = shalt.err (!%p725_p4)
}
   0xd   :  { %s818_s27 = smov 128   ;;  %s819_s28 = smov 8  }
   0xe   :  { %37 = dma.hbm_to_vmem [thread:$0]  %s908_s1, 8192, %s32_s25, [#allocation6], %s818_s27, %s818_s27, %s819_s28  }
   0xf   :  { %s820_s8 = smov [#allocation2]   ;;  %s821_s10 = smov [#allocation7]  }
  0x10   :  { %s22_s9 = sshll.u32 %s820_s8, 4  ;;  %s45_s11 = sshll.u32 %s821_s10, 4  ;;  %s23_s9 = int_to_ptr.vmem [resolvable:$true] %s22_s9  ;;  %s46_s11 = int_to_ptr.vmem [resolvable:$true] %s45_s11 }
  0x11   :  { %s737_s12 = scalar_lea.vmem %s23_s9, 512  ;;  %p742_p6 = scmp.lt.s32.totalorder %s23_s9, %s23_s9 }
  0x12   :  { %p738_p5 = scmp.ne.s32.totalorder %s23_s9, %s737_s12  ;;  %p743_p7 = scmp.lt.s32.totalorder %s737_s12, %s737_s12 }
  0x14   :  { %p744_p8 = por %p743_p7, %p742_p6 }
  0x16   :  { %p745_p9 = pnand %p744_p8, %p738_p5 }
  0x18   :  { %748 = shalt.err (!%p745_p9)
}
  0x19   :  { %25 = dma.hbm_to_vmem [thread:$0]  %s907_s0, 512, %s23_s9, [#allocation3]  }
  0x1a   :  { %s757_s15 = scalar_lea.vmem %s46_s11, 8192  ;;  %p762_p11 = scmp.lt.s32.totalorder %s46_s11, %s46_s11 }
  0x1b   :  { %p758_p10 = scmp.ne.s32.totalorder %s46_s11, %s757_s15  ;;  %p763_p12 = scmp.lt.s32.totalorder %s757_s15, %s757_s15 }
  0x1d   :  { %p764_p13 = por %p763_p12, %p762_p11 }
  0x1f   :  { %p765_p0 = pnand %p764_p13, %p758_p10 }
  0x21   :  { %768 = shalt.err (!%p765_p0)
}
  0x22   :  { %s822_s1 = smov 512   ;;  %s823_s16 = smov 32  }
  0x23   :  { %51 = dma.hbm_to_vmem [thread:$0]  %s910_s3, 8192, %s46_s11, [#allocation6], %s822_s1, %s822_s1, %s823_s16  }
  0x24   :  { %s824_s19 = smov [#allocation8]  }
  0x25   :  { %s62_s20 = sshll.u32 %s824_s19, 4  ;;  %s63_s20 = int_to_ptr.vmem [resolvable:$true] %s62_s20 }
  0x26   :  { %s777_s21 = scalar_lea.vmem %s63_s20, 64  ;;  %p782_p2 = scmp.lt.s32.totalorder %s63_s20, %s63_s20 }
  0x27   :  { %p778_p1 = scmp.ne.s32.totalorder %s63_s20, %s777_s21  ;;  %p783_p3 = scmp.lt.s32.totalorder %s777_s21, %s777_s21 }
  0x29   :  { %p784_p4 = por %p783_p3, %p782_p2 }
  0x2b   :  { %p785_p5 = pnand %p784_p4, %p778_p1 }
  0x2d   :  { %788 = shalt.err (!%p785_p5)
}
  0x2e   :  { %65 = dma.hbm_to_vmem [thread:$0]  %s913_s6, 64, %s63_s20, [#allocation9]  }
  0x2f   :  { %809 = dma.done.wait [#allocation3], 512  }
  0x30   :  { %810 = vsyncadd [#allocation3], 4294966784 }
  0x31   :  { %811 = dma.done.wait [#allocation6], 16384  }
  0x32   :  { %812 = vsyncadd [#allocation6], 4294950912 }
  0x33   :  { %813 = dma.done.wait [#allocation9], 64  }
  0x34   :  { %814 = vsyncadd [#allocation9], 4294967232  ;;  %v117_v0 = vld [vmem:[#allocation5 + $0xf8] sm:$0xff]  ;;  %v116_v4 = vld [vmem:[#allocation5 + $0xf0] sm:$0xff]  ;;  %s826_s25 = smov [#allocation10]  }
  0x35   :  { %v149_v1 = vld [vmem:[#allocation5 + $0x1f8] sm:$0xff]  ;;  %627 = vmatprep.subr.mxu0 %v117_v0  ;;  %v148_v5 = vld [vmem:[#allocation5 + $0x1f0] sm:$0xff]  ;;  %v115_v8 = vld [vmem:[#allocation5 + $0xe8] sm:$0xff] }
  0x36   :  { %v101_v2 = vld [vmem:[#allocation5 + $0x78] sm:$0xff]  ;;  %662 = vmatprep.subr.mxu1 %v149_v1  ;;  %v100_v6 = vld [vmem:[#allocation5 + $0x70] sm:$0xff]  ;;  %v147_v9 = vld [vmem:[#allocation5 + $0x1e8] sm:$0xff] }
  0x37   :  { %v133_v3 = vld [vmem:[#allocation5 + $0x178] sm:$0xff]  ;;  %628 = vmatpush3.msra.mxu0 %v101_v2  ;;  %v132_v7 = vld [vmem:[#allocation5 + $0x170] sm:$0xff]  ;;  %v99_v10 = vld [vmem:[#allocation5 + $0x68] sm:$0xff] }
  0x38   :  { %663 = vmatpush3.msra.mxu1 %v133_v3  ;;  %629 = vmatprep.subr.mxu0 %v116_v4  ;;  %v131_v11 = vld [vmem:[#allocation5 + $0x168] sm:$0xff]  ;;  %v114_v12 = vld [vmem:[#allocation5 + $0xe0] sm:$0xff]  ;;  %v113_v16 = vld [vmem:[#allocation5 + $0xd8] sm:$0xff] }
  0x39   :  { %664 = vmatprep.subr.mxu1 %v148_v5  ;;  %630 = vmatpush3.msra.mxu0 %v100_v6  ;;  %v146_v13 = vld [vmem:[#allocation5 + $0x1e0] sm:$0xff]  ;;  %v145_v17 = vld [vmem:[#allocation5 + $0x1d8] sm:$0xff]  ;;  %v112_v20 = vld [vmem:[#allocation5 + $0xd0] sm:$0xff] }
  0x3a   :  { %665 = vmatpush3.msra.mxu1 %v132_v7  ;;  %631 = vmatprep.subr.mxu0 %v115_v8  ;;  %v98_v14 = vld [vmem:[#allocation5 + $0x60] sm:$0xff]  ;;  %v97_v18 = vld [vmem:[#allocation5 + $0x58] sm:$0xff]  ;;  %v144_v21 = vld [vmem:[#allocation5 + $0x1d0] sm:$0xff] }
  0x3b   :  { %666 = vmatprep.subr.mxu1 %v147_v9  ;;  %v130_v15 = vld [vmem:[#allocation5 + $0x160] sm:$0xff]  ;;  %632 = vmatpush3.msra.mxu0 %v99_v10  ;;  %v129_v19 = vld [vmem:[#allocation5 + $0x158] sm:$0xff]  ;;  %v96_v22 = vld [vmem:[#allocation5 + $0x50] sm:$0xff] }
  0x3c   :  { %667 = vmatpush3.msra.mxu1 %v131_v11  ;;  %633 = vmatprep.subr.mxu0 %v114_v12  ;;  %v128_v23 = vld [vmem:[#allocation5 + $0x150] sm:$0xff]  ;;  %v111_v24 = vld [vmem:[#allocation5 + $0xc8] sm:$0xff]  ;;  %v110_v28 = vld [vmem:[#allocation5 + $0xc0] sm:$0xff] }
  0x3d   :  { %668 = vmatprep.subr.mxu1 %v146_v13  ;;  %634 = vmatpush3.msra.mxu0 %v98_v14  ;;  %v143_v25 = vld [vmem:[#allocation5 + $0x1c8] sm:$0xff]  ;;  %v142_v29 = vld [vmem:[#allocation5 + $0x1c0] sm:$0xff]  ;;  %v109_v32 = vld [vmem:[#allocation5 + $0xb8] sm:$0xff] }
  0x3e   :  { %669 = vmatpush3.msra.mxu1 %v130_v15  ;;  %635 = vmatprep.subr.mxu0 %v113_v16  ;;  %v95_v26 = vld [vmem:[#allocation5 + $0x48] sm:$0xff]  ;;  %v94_v30 = vld [vmem:[#allocation5 + $0x40] sm:$0xff]  ;;  %v141_v33 = vld [vmem:[#allocation5 + $0x1b8] sm:$0xff] }
  0x3f   :  { %670 = vmatprep.subr.mxu1 %v145_v17  ;;  %636 = vmatpush3.msra.mxu0 %v97_v18  ;;  %v127_v27 = vld [vmem:[#allocation5 + $0x148] sm:$0xff]  ;;  %v126_v31 = vld [vmem:[#allocation5 + $0x140] sm:$0xff]  ;;  %v93_v34 = vld [vmem:[#allocation5 + $0x38] sm:$0xff] }
  0x40   :  { %671 = vmatpush3.msra.mxu1 %v129_v19  ;;  %637 = vmatprep.subr.mxu0 %v112_v20  ;;  %v125_v35 = vld [vmem:[#allocation5 + $0x138] sm:$0xff]  ;;  %v108_v36 = vld [vmem:[#allocation5 + $0xb0] sm:$0xff]  ;;  %v107_v40 = vld [vmem:[#allocation5 + $0xa8] sm:$0xff] }
  0x41   :  { %672 = vmatprep.subr.mxu1 %v144_v21  ;;  %638 = vmatpush3.msra.mxu0 %v96_v22  ;;  %v140_v37 = vld [vmem:[#allocation5 + $0x1b0] sm:$0xff]  ;;  %v139_v41 = vld [vmem:[#allocation5 + $0x1a8] sm:$0xff]  ;;  %v106_v44 = vld [vmem:[#allocation5 + $0xa0] sm:$0xff] }
  0x42   :  { %673 = vmatpush3.msra.mxu1 %v128_v23  ;;  %639 = vmatprep.subr.mxu0 %v111_v24  ;;  %v92_v38 = vld [vmem:[#allocation5 + $0x30] sm:$0xff]  ;;  %v91_v42 = vld [vmem:[#allocation5 + $0x28] sm:$0xff]  ;;  %v138_v45 = vld [vmem:[#allocation5 + $0x1a0] sm:$0xff] }
  0x43   :  { %674 = vmatprep.subr.mxu1 %v143_v25  ;;  %640 = vmatpush3.msra.mxu0 %v95_v26  ;;  %v124_v39 = vld [vmem:[#allocation5 + $0x130] sm:$0xff]  ;;  %v123_v43 = vld [vmem:[#allocation5 + $0x128] sm:$0xff]  ;;  %v90_v46 = vld [vmem:[#allocation5 + $0x20] sm:$0xff] }
  0x44   :  { %675 = vmatpush3.msra.mxu1 %v127_v27  ;;  %641 = vmatprep.subr.mxu0 %v110_v28  ;;  %v122_v47 = vld [vmem:[#allocation5 + $0x120] sm:$0xff]  ;;  %v105_v48 = vld [vmem:[#allocation5 + $0x98] sm:$0xff]  ;;  %v104_v52 = vld [vmem:[#allocation5 + $0x90] sm:$0xff] }
  0x45   :  { %676 = vmatprep.subr.mxu1 %v142_v29  ;;  %642 = vmatpush3.msra.mxu0 %v94_v30  ;;  %v137_v49 = vld [vmem:[#allocation5 + $0x198] sm:$0xff]  ;;  %v136_v53 = vld [vmem:[#allocation5 + $0x190] sm:$0xff]  ;;  %v103_v56 = vld [vmem:[#allocation5 + $0x88] sm:$0xff] }
  0x46   :  { %677 = vmatpush3.msra.mxu1 %v126_v31  ;;  %643 = vmatprep.subr.mxu0 %v109_v32  ;;  %v89_v50 = vld [vmem:[#allocation5 + $0x18] sm:$0xff]  ;;  %v88_v54 = vld [vmem:[#allocation5 + $0x10] sm:$0xff]  ;;  %v135_v57 = vld [vmem:[#allocation5 + $0x188] sm:$0xff] }
  0x47   :  { %678 = vmatprep.subr.mxu1 %v141_v33  ;;  %644 = vmatpush3.msra.mxu0 %v93_v34  ;;  %v121_v51 = vld [vmem:[#allocation5 + $0x118] sm:$0xff]  ;;  %v120_v55 = vld [vmem:[#allocation5 + $0x110] sm:$0xff]  ;;  %v87_v58 = vld [vmem:[#allocation5 + $0x8] sm:$0xff] }
  0x48   :  { %679 = vmatpush3.msra.mxu1 %v125_v35  ;;  %645 = vmatprep.subr.mxu0 %v108_v36  ;;  %v119_v59 = vld [vmem:[#allocation5 + $0x108] sm:$0xff]  ;;  %v102_v60 = vld [vmem:[#allocation5 + $0x80] sm:$0xff]  ;;  %v881_v1 = vld [vmem:[#allocation2 + $0x18] sm:$0xff] }
  0x49   :  { %680 = vmatprep.subr.mxu1 %v140_v37  ;;  %646 = vmatpush3.msra.mxu0 %v92_v38  ;;  %v134_v61 = vld [vmem:[#allocation5 + $0x180] sm:$0xff]  ;;  %v879_v63 = vld [vmem:[#allocation2 + $0x8] sm:$0xff]  ;;  %v885_v3 = vld [vmem:[#allocation2 + $0x10] sm:$0xff] }
  0x4a   :  { %681 = vmatpush3.msra.mxu1 %v124_v39  ;;  %647 = vmatprep.subr.mxu0 %v107_v40  ;;  %v86_v62 = vld [vmem:[#allocation5] sm:$0xff]  ;;  %v358_v4 = vld [vmem:[#allocation7 + $0x1e8] sm:$0xff]  ;;  %v360_v5 = vld [vmem:[#allocation7 + $0x1f8] sm:$0xff] }
  0x4b   :  { %682 = vmatprep.subr.mxu1 %v139_v41  ;;  %648 = vmatpush3.msra.mxu0 %v91_v42  ;;  %v118_v0 = vld [vmem:[#allocation5 + $0x100] sm:$0xff]  ;;  %v359_v7 = vld [vmem:[#allocation7 + $0x1f0] sm:$0xff]  ;;  %v354_v8 = vld [vmem:[#allocation7 + $0x1c8] sm:$0xff] }
  0x4c   :  { %683 = vmatpush3.msra.mxu1 %v123_v43  ;;  %649 = vmatprep.subr.mxu0 %v106_v44  ;;  %v883_v2 = vld [vmem:[#allocation2] sm:$0xff]  ;;  %v356_v9 = vld [vmem:[#allocation7 + $0x1d8] sm:$0xff]  ;;  %v355_v11 = vld [vmem:[#allocation7 + $0x1d0] sm:$0xff] }
  0x4d   :  { %684 = vmatprep.subr.mxu1 %v138_v45  ;;  %650 = vmatpush3.msra.mxu0 %v90_v46  ;;  %v357_v6 = vld [vmem:[#allocation7 + $0x1e0] sm:$0xff]  ;;  %v350_v12 = vld [vmem:[#allocation7 + $0x1a8] sm:$0xff]  ;;  %v352_v13 = vld [vmem:[#allocation7 + $0x1b8] sm:$0xff] }
  0x4e   :  { %685 = vmatpush3.msra.mxu1 %v122_v47  ;;  %651 = vmatprep.subr.mxu0 %v105_v48  ;;  %v353_v10 = vld [vmem:[#allocation7 + $0x1c0] sm:$0xff]  ;;  %v351_v15 = vld [vmem:[#allocation7 + $0x1b0] sm:$0xff]  ;;  %v346_v16 = vld [vmem:[#allocation7 + $0x188] sm:$0xff] }
  0x4f   :  { %686 = vmatprep.subr.mxu1 %v137_v49  ;;  %652 = vmatpush3.msra.mxu0 %v89_v50  ;;  %v349_v14 = vld [vmem:[#allocation7 + $0x1a0] sm:$0xff]  ;;  %v348_v17 = vld [vmem:[#allocation7 + $0x198] sm:$0xff]  ;;  %v347_v19 = vld [vmem:[#allocation7 + $0x190] sm:$0xff] }
  0x50   :  { %687 = vmatpush3.msra.mxu1 %v121_v51  ;;  %653 = vmatprep.subr.mxu0 %v104_v52  ;;  %v345_v18 = vld [vmem:[#allocation7 + $0x180] sm:$0xff]  ;;  %v342_v20 = vld [vmem:[#allocation7 + $0x168] sm:$0xff]  ;;  %v344_v21 = vld [vmem:[#allocation7 + $0x178] sm:$0xff] }
  0x51   :  { %688 = vmatprep.subr.mxu1 %v136_v53  ;;  %654 = vmatpush3.msra.mxu0 %v88_v54  ;;  %v341_v22 = vld [vmem:[#allocation7 + $0x160] sm:$0xff]  ;;  %v343_v23 = vld [vmem:[#allocation7 + $0x170] sm:$0xff]  ;;  %v338_v24 = vld [vmem:[#allocation7 + $0x148] sm:$0xff] }
  0x52   :  { %689 = vmatpush3.msra.mxu1 %v120_v55  ;;  %655 = vmatprep.subr.mxu0 %v103_v56  ;;  %v340_v25 = vld [vmem:[#allocation7 + $0x158] sm:$0xff]  ;;  %v337_v26 = vld [vmem:[#allocation7 + $0x140] sm:$0xff]  ;;  %v339_v27 = vld [vmem:[#allocation7 + $0x150] sm:$0xff] }
  0x53   :  { %690 = vmatprep.subr.mxu1 %v135_v57  ;;  %656 = vmatpush3.msra.mxu0 %v87_v58  ;;  %v334_v28 = vld [vmem:[#allocation7 + $0x128] sm:$0xff]  ;;  %v336_v29 = vld [vmem:[#allocation7 + $0x138] sm:$0xff]  ;;  %v333_v30 = vld [vmem:[#allocation7 + $0x120] sm:$0xff] }
  0x54   :  { %691 = vmatpush3.msra.mxu1 %v119_v59  ;;  %657 = vmatprep.subr.mxu0 %v102_v60  ;;  %v335_v31 = vld [vmem:[#allocation7 + $0x130] sm:$0xff]  ;;  %v330_v32 = vld [vmem:[#allocation7 + $0x108] sm:$0xff]  ;;  %v332_v33 = vld [vmem:[#allocation7 + $0x118] sm:$0xff] }
  0x55   :  { %692 = vmatprep.subr.mxu1 %v134_v61  ;;  %658 = vmatpush3.msra.mxu0 %v86_v62  ;;  %v329_v34 = vld [vmem:[#allocation7 + $0x100] sm:$0xff]  ;;  %v331_v35 = vld [vmem:[#allocation7 + $0x110] sm:$0xff]  ;;  %v326_v36 = vld [vmem:[#allocation7 + $0xe8] sm:$0xff] }
  0x56   :  { %220 = vmatprep.mubr.f32.mxu0 %v879_v63  ;;  %693 = vmatpush3.msra.mxu1 %v118_v0  ;;  %v328_v37 = vld [vmem:[#allocation7 + $0xf8] sm:$0xff]  ;;  %v325_v38 = vld [vmem:[#allocation7 + $0xe0] sm:$0xff]  ;;  %v327_v39 = vld [vmem:[#allocation7 + $0xf0] sm:$0xff] }
  0x57   :  { %290 = vmatprep.mubr.f32.mxu1 %v881_v1  ;;  %221 = vmatmul.mubr.f32.vlgmr.msra.gmra.mxu0 %v883_v2  ;;  %v322_v40 = vld [vmem:[#allocation7 + $0xc8] sm:$0xff]  ;;  %v324_v41 = vld [vmem:[#allocation7 + $0xd8] sm:$0xff]  ;;  %v321_v42 = vld [vmem:[#allocation7 + $0xc0] sm:$0xff] }
  0x58   :  { %291 = vmatmul.mubr.f32.vlgmr.msra.gmra.mxu1 %v885_v3  ;;  %382 = vmatprep.subr.mxu0 %v358_v4  ;;  %v323_v43 = vld [vmem:[#allocation7 + $0xd0] sm:$0xff]  ;;  %v318_v44 = vld [vmem:[#allocation7 + $0xa8] sm:$0xff]  ;;  %v320_v45 = vld [vmem:[#allocation7 + $0xb8] sm:$0xff] }
  0x59   :  { %453 = vmatprep.subr.mxu1 %v360_v5  ;;  %383 = vmatpush1.msra.mxu0 %v357_v6  ;;  %v317_v46 = vld [vmem:[#allocation7 + $0xa0] sm:$0xff]  ;;  %v319_v47 = vld [vmem:[#allocation7 + $0xb0] sm:$0xff]  ;;  %v314_v48 = vld [vmem:[#allocation7 + $0x88] sm:$0xff] }
  0x5a   :  { %454 = vmatpush1.msra.mxu1 %v359_v7  ;;  %384 = vmatprep.subr.mxu0 %v354_v8  ;;  %v316_v49 = vld [vmem:[#allocation7 + $0x98] sm:$0xff]  ;;  %v313_v50 = vld [vmem:[#allocation7 + $0x80] sm:$0xff]  ;;  %v315_v51 = vld [vmem:[#allocation7 + $0x90] sm:$0xff]  ;;  %v825_v8 = vmov 0.0  }
  0x5b   :  { %455 = vmatprep.subr.mxu1 %v356_v9  ;;  %385 = vmatpush1.msra.mxu0 %v353_v10  ;;  %v310_v52 = vld [vmem:[#allocation7 + $0x68] sm:$0xff]  ;;  %v312_v53 = vld [vmem:[#allocation7 + $0x78] sm:$0xff]  ;;  %v309_v54 = vld [vmem:[#allocation7 + $0x60] sm:$0xff] }
  0x5c   :  { %456 = vmatpush1.msra.mxu1 %v355_v11  ;;  %386 = vmatprep.subr.mxu0 %v350_v12  ;;  %v311_v55 = vld [vmem:[#allocation7 + $0x70] sm:$0xff]  ;;  %v306_v56 = vld [vmem:[#allocation7 + $0x48] sm:$0xff]  ;;  %v308_v57 = vld [vmem:[#allocation7 + $0x58] sm:$0xff] }
  0x5d   :  { %457 = vmatprep.subr.mxu1 %v352_v13  ;;  %387 = vmatpush1.msra.mxu0 %v349_v14  ;;  %v305_v58 = vld [vmem:[#allocation7 + $0x40] sm:$0xff]  ;;  %v307_v59 = vld [vmem:[#allocation7 + $0x50] sm:$0xff]  ;;  %v302_v60 = vld [vmem:[#allocation7 + $0x28] sm:$0xff] }
  0x5e   :  { %458 = vmatpush1.msra.mxu1 %v351_v15  ;;  %388 = vmatprep.subr.mxu0 %v346_v16  ;;  %v304_v61 = vld [vmem:[#allocation7 + $0x38] sm:$0xff]  ;;  %v301_v62 = vld [vmem:[#allocation7 + $0x20] sm:$0xff]  ;;  %v303_v0 = vld [vmem:[#allocation7 + $0x30] sm:$0xff] }
  0x5f   :  { %459 = vmatprep.subr.mxu1 %v348_v17  ;;  %389 = vmatpush1.msra.mxu0 %v345_v18  ;;  %v298_v4 = vld [vmem:[#allocation7 + $0x8] sm:$0xff]  ;;  %v300_v5 = vld [vmem:[#allocation7 + $0x18] sm:$0xff]  ;;  %v297_v6 = vld [vmem:[#allocation7] sm:$0xff] }
  0x60   :  { %460 = vmatpush1.msra.mxu1 %v347_v19  ;;  %390 = vmatprep.subr.mxu0 %v342_v20  ;;  %v299_v7 = vld [vmem:[#allocation7 + $0x10] sm:$0xff]  ;;  %v626_v11 = vld [vmem:[%s909_s2] ss:$0 sm:$0xff]  ;;  %v362_v19 = vlaneseq }
  0x61   :  { %461 = vmatprep.subr.mxu1 %v344_v21  ;;  %391 = vmatpush1.msra.mxu0 %v341_v22 }
  0x62   :  { %462 = vmatpush1.msra.mxu1 %v343_v23  ;;  %392 = vmatprep.subr.mxu0 %v338_v24  ;;  %v363_v20 = vshrl.u32 %v362_v19, 7  ;;  %v83_v23 = vld [vmem:[%s911_s4] sm:$0xf] }
  0x63   :  { %463 = vmatprep.subr.mxu1 %v340_v25  ;;  %393 = vmatpush1.msra.mxu0 %v337_v26 }
  0x64   :  { %464 = vmatpush1.msra.mxu1 %v339_v27  ;;  %394 = vmatprep.subr.mxu0 %v334_v28  ;;  %v364_v21 = vsub.s32 0, %v363_v20  ;;  %v368_v22 = vsub.s32 1, %v363_v20  ;;  %v372_v24 = vsub.s32 2, %v363_v20  ;;  %v376_v27 = vsub.s32 3, %v363_v20 }
  0x65   :  { %465 = vmatprep.subr.mxu1 %v336_v29  ;;  %395 = vmatpush1.msra.mxu0 %v333_v30 }
  0x66   :  { %466 = vmatpush1.msra.mxu1 %v335_v31  ;;  %396 = vmatprep.subr.mxu0 %v330_v32  ;;  %v365_v25 = vrot.slane %v83_v23, %v364_v21  ;;  %v369_v26 = vrot.slane %v83_v23, %v368_v22  ;;  %v373_v30 = vrot.slane %v83_v23, %v372_v24 }
  0x67   :  { %467 = vmatprep.subr.mxu1 %v332_v33  ;;  %397 = vmatpush1.msra.mxu0 %v329_v34  ;;  %v377_v34 = vrot.slane %v83_v23, %v376_v27 }
  0x68   :  { %468 = vmatpush1.msra.mxu1 %v331_v35  ;;  %398 = vmatprep.subr.mxu0 %v326_v36 }
  0x69   :  { %469 = vmatprep.subr.mxu1 %v328_v37  ;;  %399 = vmatpush1.msra.mxu0 %v325_v38 }
  0x6a   :  { %470 = vmatpush1.msra.mxu1 %v327_v39  ;;  %400 = vmatprep.subr.mxu0 %v322_v40 }
  0x6b   :  { %471 = vmatprep.subr.mxu1 %v324_v41  ;;  %401 = vmatpush1.msra.mxu0 %v321_v42 }
  0x6c   :  { %472 = vmatpush1.msra.mxu1 %v323_v43  ;;  %402 = vmatprep.subr.mxu0 %v318_v44 }
  0x6d   :  { %473 = vmatprep.subr.mxu1 %v320_v45  ;;  %403 = vmatpush1.msra.mxu0 %v317_v46 }
  0x6e   :  { %474 = vmatpush1.msra.mxu1 %v319_v47  ;;  %404 = vmatprep.subr.mxu0 %v314_v48 }
  0x6f   :  { %475 = vmatprep.subr.mxu1 %v316_v49  ;;  %405 = vmatpush1.msra.mxu0 %v313_v50 }
  0x70   :  { %476 = vmatpush1.msra.mxu1 %v315_v51  ;;  %406 = vmatprep.subr.mxu0 %v310_v52 }
  0x71   :  { %477 = vmatprep.subr.mxu1 %v312_v53  ;;  %407 = vmatpush1.msra.mxu0 %v309_v54 }
  0x72   :  { %478 = vmatpush1.msra.mxu1 %v311_v55  ;;  %408 = vmatprep.subr.mxu0 %v306_v56 }
  0x73   :  { %479 = vmatprep.subr.mxu1 %v308_v57  ;;  %409 = vmatpush1.msra.mxu0 %v305_v58  ;;  %v84_v57 = vld [vmem:[%s912_s5] sm:$0xf]  ;;  %s615_s5 = sshll.u32 %s826_s25, 4  ;;  %s616_s5 = int_to_ptr.vmem [resolvable:$true] %s615_s5 }
  0x74   :  { %480 = vmatpush1.msra.mxu1 %v307_v59  ;;  %410 = vmatprep.subr.mxu0 %v302_v60  ;;  %v85_v58 = vld [vmem:[#allocation8] sm:$0xf]  ;;  %v555_v59 = vrot.slane %v84_v57, %v364_v21  ;;  %v563_v60 = vrot.slane %v84_v57, %v372_v24  ;;  %s789_s26 = scalar_lea.vmem %s616_s5, 512  ;;  %p794_p7 = scmp.lt.s32.totalorder %s616_s5, %s616_s5 }
  0x75   :  { %481 = vmatprep.subr.mxu1 %v304_v61  ;;  %411 = vmatpush1.msra.mxu0 %v301_v62  ;;  %v559_v61 = vrot.slane %v84_v57, %v368_v22  ;;  %v567_v62 = vrot.slane %v84_v57, %v376_v27  ;;  %p790_p6 = scmp.ne.s32.totalorder %s616_s5, %s789_s26  ;;  %p795_p8 = scmp.lt.s32.totalorder %s789_s26, %s789_s26 }
  0x76   :  { %482 = vmatpush1.msra.mxu1 %v303_v0  ;;  %412 = vmatprep.subr.mxu0 %v298_v4  ;;  %v580_v4 = vrot.slane %v85_v58, %v364_v21 }
  0x77   :  { %483 = vmatprep.subr.mxu1 %v300_v5  ;;  %413 = vmatpush1.msra.mxu0 %v297_v6  ;;  %v588_v5 = vrot.slane %v85_v58, %v372_v24  ;;  %v584_v6 = vrot.slane %v85_v58, %v368_v22  ;;  %p796_p9 = por %p795_p8, %p794_p7 }
  0x78   :  { %446 = vmatprep.mubr.f32.mxu0 %v825_v8  ;;  %484 = vmatpush1.msra.mxu1 %v299_v7  ;;  %v592_v7 = vrot.slane %v85_v58, %v376_v27 }
  0x79   :  { %517 = vmatprep.mubr.f32.mxu1 %v825_v8  ;;  %p797_p10 = pnand %p796_p9, %p790_p6 }
 0x117   :  { %v659_v9 = vpop.f32.mrf.mxu0 }
 0x118   :  { %v694_v10 = vpop.f32.mrf.mxu1 }
 0x119   :  { %v660_v12 = vpop.f32.mrf.mxu0 }
 0x11a   :  { %v695_v13 = vpop.f32.mrf.mxu1  ;;  %v661_v14 = vadd.f32 %v660_v12, %v659_v9 }
 0x11b   :  { %v696_v16 = vadd.f32 %v695_v13, %v694_v10 }
 0x11c   :  { %v223_v15 = vadd.f32 %v661_v14, %v626_v11 }
 0x11e   :  { %v293_v17 = vadd.f32 %v696_v16, %v223_v15 }
 0x120   :  { %v296_v18 = vmax.f32 %v293_v17, 0.0 }
 0x122   :  { %447 = vmatmul.mubr.f32.vlgmr.msra.gmra.mxu0 %v296_v18  ;;  %518 = vmatmul.mubr.f32.vlgmr.msra.gmra.mxu1 %v296_v18 }
 0x1e2   :  { %v448_v28 = vpop.f32.mrf.mxu0  ;;  %v519_v29 = vpop.f32.mrf.mxu1 }
 0x1e3   :  { %v449_v32 = vadd.f32 %v448_v28, %v365_v25  ;;  %v520_v36 = vadd.f32 %v519_v29, %v373_v30 }
 0x1e4   :  { %v450_v31 = vpop.f32.mrf.mxu0  ;;  %v521_v35 = vpop.f32.mrf.mxu1 }
 0x1e5   :  { %v451_v33 = vadd.f32 %v450_v31, %v369_v26  ;;  %v522_v38 = vadd.f32 %v521_v35, %v377_v34 }
 0x1e7   :  { %v524_v37 = vadd.f32 %v451_v33, %v449_v32 }
 0x1e9   :  { %v525_v39 = vadd.f32 %v524_v37, %v520_v36 }
 0x1eb   :  { %v526_v40 = vadd.f32 %v525_v39, %v522_v38 }
 0x1ed   :  { %527 = vadd.xlane.f32.xlu0 %v526_v40 }
 0x276   :  { %v528_v41 = vpop.xlane.xlu0 %527 }
 0x277   :  { %v530_v42 = vmul.f32 0.001953125, %v528_v41 }
 0x279   :  { %v531_v43 = vsub.f32 %v449_v32, %v530_v42  ;;  %v532_v44 = vsub.f32 %v451_v33, %v530_v42  ;;  %v533_v45 = vsub.f32 %v520_v36, %v530_v42  ;;  %v534_v46 = vsub.f32 %v522_v38, %v530_v42 }
 0x27b   :  { %v535_v47 = vmul.f32 %v531_v43, %v531_v43  ;;  %v536_v48 = vmul.f32 %v532_v44, %v532_v44  ;;  %v537_v49 = vmul.f32 %v533_v45, %v533_v45  ;;  %v538_v51 = vmul.f32 %v534_v46, %v534_v46 }
 0x27d   :  { %v539_v50 = vadd.f32 %v536_v48, %v535_v47 }
 0x27f   :  { %v540_v52 = vadd.f32 %v539_v50, %v537_v49 }
 0x281   :  { %v541_v53 = vadd.f32 %v540_v52, %v538_v51 }
 0x283   :  { %542 = vadd.xlane.f32.xlu0 %v541_v53 }
 0x30c   :  { %v543_v54 = vpop.xlane.xlu0 %542 }
 0x30d   :  { %v544_v55 = vmul.f32 0.001953125, %v543_v54 }
 0x30f   :  { %v545_v56 = vadd.f32 1e-05, %v544_v55 }
 0x311   :  { %707 = vrsqrt.f32 %v545_v56 }
 0x31e   :  { %v708_v0 = vpop.eup %707 }
 0x31f   :  { %v547_v8 = vmul.f32 %v708_v0, %v531_v43  ;;  %v548_v9 = vmul.f32 %v708_v0, %v532_v44  ;;  %v549_v10 = vmul.f32 %v708_v0, %v533_v45  ;;  %v550_v11 = vmul.f32 %v708_v0, %v534_v46 }
 0x321   :  { %v572_v12 = vmul.f32 %v555_v59, %v547_v8  ;;  %v573_v13 = vmul.f32 %v559_v61, %v548_v9  ;;  %v574_v14 = vmul.f32 %v563_v60, %v549_v10  ;;  %v575_v15 = vmul.f32 %v567_v62, %v550_v11 }
 0x323   :  { %v597_v16 = vadd.f32 %v580_v4, %v572_v12  ;;  %v598_v17 = vadd.f32 %v584_v6, %v573_v13  ;;  %v599_v18 = vadd.f32 %v588_v5, %v574_v14  ;;  %v600_v19 = vadd.f32 %v592_v7, %v575_v15 }
 0x325   :  { %v601_v20 = vadd.f32 %v597_v16, %v883_v2  ;;  %v602_v21 = vadd.f32 %v598_v17, %v879_v63  ;;  %v603_v22 = vadd.f32 %v599_v18, %v885_v3  ;;  %v604_v23 = vadd.f32 %v600_v19, %v881_v1 }
 0x327   :  { %605 = vst [vmem:[#allocation10] sm:$0xff] %v601_v20  ;;  %606 = vst [vmem:[#allocation10 + $0x8] sm:$0xff] %v602_v21 }
 0x328   :  { %607 = vst [vmem:[#allocation10 + $0x10] sm:$0xff] %v603_v22  ;;  %608 = vst [vmem:[#allocation10 + $0x18] sm:$0xff] %v604_v23 }
 0x329   :  { %800 = shalt.err (!%p797_p10)
}
 0x32a   :  { %618 = dma.vmem_to_hbm [thread:$0]  %s616_s5, 512, %s914_s7, [#allocation4]  }
 0x32b   :  { %815 = dma.done.wait [#allocation4], 512  }
 0x32c   :  { %816 = vsyncadd [#allocation4], 4294966784 }
 0x32d   :  { %622 = vsyncpa [#allocation3], 1 }
 0x32e   :  { %623 = vsyncpa [#allocation6], 1 }
 0x32f   :  { %624 = vsyncpa [#allocation9], 1 }
 0x330   :  { %625 = vsyncpa [#allocation4], 1 }

</bundles_post_ra>
